<compile_context>
chip_gen: v7x
topology: tpu7x:2x2x1
jax: 0.10.0
libtpu: 0.0.40
codegen_flags: <defaults>
</compile_context>

<pallas_src>
import functools

import jax
import jax.numpy as jnp
from jax.experimental import pallas as pl
from jax.experimental.pallas import tpu as pltpu


# ------------------------------------------------------------ fused kernel --
def _fused_kernel(x_ref, w1_ref, b1_ref, wes_ref, w2_ref, b2_ref,
                  stt_ref, recon_ref, mu_ref, lv_ref, kl_ref, *, beta):
    """Channel-major fused STT + TTS-VAE forward for one (batch, T-tile) block.

    x_ref   : (C, tile_t)    mel block, time in lanes
    w1_ref  : (Hs+He, C)     [W_stt ; We_x]          (merged, shared RHS x)
    b1_ref  : (Hs+He, 1)     [b_stt ; be]
    wes_ref : (He, Hs)       We_s
    w2_ref  : (2Z+C, He)     [Wmu ; Wlv ; Wmu@Wd]    (decoder folded, z = mu)
    b2_ref  : (2Z+C, 1)      [bmu ; blv ; bmu@Wd+bd]
    outputs : stt (Hs,t)  recon (C,t)  mu (Z,t)  lv (Z,t)  kl (1,t)
    """
    x = x_ref[...]                                    # (C, tile_t) f32
    hs = stt_ref.shape[0]
    z = mu_ref.shape[0]

    # ---- merged STT projection + encoder input projection (one MXU issue) --
    xh = jnp.dot(w1_ref[...], x,
                 preferred_element_type=jnp.float32) + b1_ref[...]
    stt = jnp.maximum(xh[:hs, :], 0.0)                # (Hs, tile_t)
    stt_ref[...] = stt

    # ---- TTS encoder hidden state ------------------------------------------
    h = jnp.tanh(xh[hs:, :] +
                 jnp.dot(wes_ref[...], stt, preferred_element_type=jnp.float32))

    # ---- merged mu/logvar heads + folded decoder (z = mu, deterministic) ---
    hd = jnp.dot(w2_ref[...], h,
                 preferred_element_type=jnp.float32) + b2_ref[...]
    mu = hd[:z, :]
    lv = hd[z:2 * z, :]
    mu_ref[...] = mu
    lv_ref[...] = lv
    recon_ref[...] = hd[2 * z:, :]                    # (C, tile_t)

    # ---- KL per frame: exp on the EUP, sublane reduce, all f32 -------------
    kl_ref[...] = (-0.5 * beta) * jnp.sum(
        1.0 + lv - mu * mu - jnp.exp(lv), axis=0, keepdims=True)


# ----------------------------------------------------------------- helpers --
def _choose_t_tile(t, max_tile):
    """Largest T-tile <= max_tile; tile only if a 128-multiple divides T.

    Falls back to whole-T blocks so there is never any row padding.
    """
    if t <= max_tile:
        return t
    cand = max_tile - max_tile % 128
    while cand >= 128:
        if t % cand == 0:
            return cand
        cand -= 128
    return t


def init_params(key, c_in, h_stt, h_enc, z_ch):
    ks = jax.random.split(key, 6)
    n = lambda k, s: (0.1 * jax.random.normal(k, s)).astype(jnp.float32)
    return {
        "w_stt": n(ks[0], (c_in, h_stt)),
        "b_stt": jnp.zeros((1, h_stt), jnp.float32),
        "we_x": n(ks[1], (c_in, h_enc)),
        "we_s": n(ks[2], (h_stt, h_enc)),
        "be":   jnp.zeros((1, h_enc), jnp.float32),
        "wmu":  n(ks[3], (h_enc, z_ch)),
        "bmu":  jnp.zeros((1, z_ch), jnp.float32),
        "wlv":  n(ks[4], (h_enc, z_ch)),
        "blv":  jnp.zeros((1, z_ch), jnp.float32),
        "wd":   n(ks[5], (z_ch, c_in)),
        "bd":   jnp.zeros((1, c_in), jnp.float32),
    }


# ---------------------------------------------------------------- wrapper ---
@functools.partial(jax.jit, static_argnames=("beta", "max_t_tile"))
def model_forward(mel_nct, params, beta=1.0, max_t_tile=1024):
    """mel_nct: (B, C, T) like PyTorch NCT. Returns (stt_outputs, tts_outputs)."""
    B, C, T = mel_nct.shape
    Hs = params["w_stt"].shape[1]
    He = params["we_x"].shape[1]
    Z = params["wmu"].shape[1]

    # ---- weight packing: channel-major operands, shared-LHS matmuls merged,
    #      decoder folded through the mu head (z = mu deterministically) ------
    w1 = jnp.concatenate([params["w_stt"], params["we_x"]], axis=1).T     # (Hs+He, C)
    b1 = jnp.concatenate([params["b_stt"], params["be"]], axis=1).T       # (Hs+He, 1)
    wes = params["we_s"].T                                                # (He, Hs)
    wd_fold = params["wmu"] @ params["wd"]                                # (He, C)
    bd_fold = params["bmu"] @ params["wd"] + params["bd"]                 # (1, C)
    w2 = jnp.concatenate([params["wmu"], params["wlv"], wd_fold], axis=1).T  # (2Z+C, He)
    b2 = jnp.concatenate([params["bmu"], params["blv"], bd_fold], axis=1).T  # (2Z+C, 1)

    tile_t = _choose_t_tile(T, max_t_tile)
    grid = (B, T // tile_t)

    # grid-invariant weights: constant index_map -> fetched once.
    # (At real hidden sizes, add pipeline_mode=pl.Buffered(1) to single-buffer.)
    inv = lambda arr: pl.BlockSpec(arr.shape, lambda b, t: (0, 0))
    bmap = lambda b, t: (b, 0, t)   # (batch, channels-full, t-tile)

    # advisory cost estimate for the XLA scheduler
    R = B * T
    flops = 2 * R * (C * (Hs + He) + Hs * He + He * (2 * Z + C)) \
        + 8 * R * (Hs + He + Z)
    transcendentals = R * (He + Z)
    bytes_accessed = 4 * (R * (2 * C + Hs + 2 * Z + 1)
                          + w1.size + b1.size + wes.size + w2.size + b2.size)

    stt, recon, mu, lv, kl3 = pl.pallas_call(
        functools.partial(_fused_kernel, beta=float(beta)),
        out_shape=(
            jax.ShapeDtypeStruct((B, Hs, T), jnp.float32),   # STT features
            jax.ShapeDtypeStruct((B, C, T), jnp.float32),    # reconstruction (NCT)
            jax.ShapeDtypeStruct((B, Z, T), jnp.float32),    # mu
            jax.ShapeDtypeStruct((B, Z, T), jnp.float32),    # logvar
            jax.ShapeDtypeStruct((B, 1, T), jnp.float32),    # KL per frame
        ),
        grid=grid,
        in_specs=[
            pl.BlockSpec((None, C, tile_t), bmap),           # mel, no transpose/pad
            inv(w1), inv(b1), inv(wes), inv(w2), inv(b2),
        ],
        out_specs=(
            pl.BlockSpec((None, Hs, tile_t), bmap),
            pl.BlockSpec((None, C, tile_t), bmap),
            pl.BlockSpec((None, Z, tile_t), bmap),
            pl.BlockSpec((None, Z, tile_t), bmap),
            pl.BlockSpec((None, 1, tile_t), bmap),
        ),
        compiler_params=pltpu.CompilerParams(
            dimension_semantics=("parallel", "parallel")),
        cost_estimate=pl.CostEstimate(
            flops=int(flops),
            transcendentals=int(transcendentals),
            bytes_accessed=int(bytes_accessed)),
    )(mel_nct, w1, b1, wes, w2, b2)

    kl = kl3[:, 0, :]                                  # (B, T)
    tts_outputs = (recon, mu, lv, kl)
    return stt, tts_outputs


# ----------------------------------------------------------- demo / checks --
if __name__ == "__main__":
    # small shapes consistent with the module (mel-like input, NCT layout)
    B, C_IN, T = 2, 16, 8
    H_STT, H_ENC, Z_CH = 32, 32, 8

    key = jax.random.PRNGKey(0)
    k_x, k_p = jax.random.split(key)
    mel = jax.random.normal(k_x, (B, C_IN, T), dtype=jnp.float32)
    params = init_params(k_p, C_IN, H_STT, H_ENC, Z_CH)

    stt_out, tts_out = model_forward(mel, params, beta=1.0)
    jax.block_until_ready((stt_out, tts_out))
    recon, mu, lv, kl = tts_out

    assert stt_out.shape == (B, H_STT, T)
    assert recon.shape == (B, C_IN, T)
    assert mu.shape == (B, Z_CH, T)
    assert lv.shape == (B, Z_CH, T)
    assert kl.shape == (B, T)

    # pure-JAX reference of the same stand-in pipeline (sanity check)
    def ref_forward(x_nct, p, beta=1.0):
        x = jnp.transpose(x_nct, (0, 2, 1))                       # (B, T, C)
        stt = jax.nn.relu(x @ p["w_stt"] + p["b_stt"])
        h = jnp.tanh(x @ p["we_x"] + stt @ p["we_s"] + p["be"])
        mu_r = h @ p["wmu"] + p["bmu"]
        lv_r = h @ p["wlv"] + p["blv"]
        rec = mu_r @ p["wd"] + p["bd"]                            # z = mu
        kl_r = beta * (-0.5) * jnp.sum(
            1.0 + lv_r - mu_r * mu_r - jnp.exp(lv_r), axis=-1)
        t = lambda a: jnp.transpose(a, (0, 2, 1))
        return t(stt), t(rec), t(mu_r), t(lv_r), kl_r

    refs = ref_forward(mel, params, 1.0)
    for got, want in zip((stt_out, recon, mu, lv, kl), refs):
        assert got.shape == want.shape
        assert float(jnp.max(jnp.abs(got - want))) < 2e-2

    print("KERNEL_OK")
</pallas_src>

<mosaic_0001>
module attributes {stable_mosaic.version = 11 : i64} {
  func.func @_fused_kernel(%arg0: i32, %arg1: i32, %arg2: memref<1x16x8xf32, #tpu.memory_space<vmem>>, %arg3: memref<64x16xf32, #tpu.memory_space<vmem>>, %arg4: memref<64x1xf32, #tpu.memory_space<vmem>>, %arg5: memref<32x32xf32, #tpu.memory_space<vmem>>, %arg6: memref<32x32xf32, #tpu.memory_space<vmem>>, %arg7: memref<32x1xf32, #tpu.memory_space<vmem>>, %arg8: memref<1x32x8xf32, #tpu.memory_space<vmem>>, %arg9: memref<1x16x8xf32, #tpu.memory_space<vmem>>, %arg10: memref<1x8x8xf32, #tpu.memory_space<vmem>>, %arg11: memref<1x8x8xf32, #tpu.memory_space<vmem>>, %arg12: memref<1x1x8xf32, #tpu.memory_space<vmem>>) attributes {dimension_semantics = [#tpu.dimension_semantics<parallel>, #tpu.dimension_semantics<parallel>], iteration_bounds = array<i64: 2, 1>, scalar_prefetch = 0 : i64, scratch_operands = 0 : i64, tpu.core_type = #tpu.core_type<tc>, window_params = [{transform_indices = @transform_0, window_bounds = array<i64: 1, 16, 8>}, {pipeline_mode = #tpu.pipeline_mode<synchronous>, transform_indices = @transform_1, window_bounds = array<i64: 64, 16>}, {pipeline_mode = #tpu.pipeline_mode<synchronous>, transform_indices = @transform_2, window_bounds = array<i64: 64, 1>}, {pipeline_mode = #tpu.pipeline_mode<synchronous>, transform_indices = @transform_3, window_bounds = array<i64: 32, 32>}, {pipeline_mode = #tpu.pipeline_mode<synchronous>, transform_indices = @transform_4, window_bounds = array<i64: 32, 32>}, {pipeline_mode = #tpu.pipeline_mode<synchronous>, transform_indices = @transform_5, window_bounds = array<i64: 32, 1>}, {transform_indices = @transform_6, window_bounds = array<i64: 1, 32, 8>}, {transform_indices = @transform_7, window_bounds = array<i64: 1, 16, 8>}, {transform_indices = @transform_8, window_bounds = array<i64: 1, 8, 8>}, {transform_indices = @transform_9, window_bounds = array<i64: 1, 8, 8>}, {transform_indices = @transform_10, window_bounds = array<i64: 1, 1, 8>}]} {
    %c0 = arith.constant 0 : index
    %c0_0 = arith.constant 0 : index
    %c0_1 = arith.constant 0 : index
    %0 = vector.load %arg2[%c0, %c0_0, %c0_1] : memref<1x16x8xf32, #tpu.memory_space<vmem>>, vector<1x16x8xf32>
    %1 = vector.shape_cast %0 : vector<1x16x8xf32> to vector<16x8xf32>
    %c0_2 = arith.constant 0 : index
    %c0_3 = arith.constant 0 : index
    %2 = vector.load %arg3[%c0_2, %c0_3] : memref<64x16xf32, #tpu.memory_space<vmem>>, vector<64x16xf32>
    %cst = arith.constant dense<0.000000e+00> : vector<64x8xf32>
    %3 = tpu.matmul %2, %1, %cst {dimension_numbers = #tpu.dot_dimension_numbers<[1], [0], [0], [1], [0, 0, 1, 1], [], []>} : vector<64x16xf32>, vector<16x8xf32>, vector<64x8xf32> -> vector<64x8xf32>
    %c0_4 = arith.constant 0 : index
    %c0_5 = arith.constant 0 : index
    %4 = vector.load %arg4[%c0_4, %c0_5] : memref<64x1xf32, #tpu.memory_space<vmem>>, vector<64x1xf32>
    %5 = vector.broadcast %4 : vector<64x1xf32> to vector<64x8xf32>
    %6 = arith.addf %3, %5 : vector<64x8xf32>
    %7 = vector.extract_strided_slice %6 {offsets = [0, 0], sizes = [32, 8], strides = [1, 1]} : vector<64x8xf32> to vector<32x8xf32>
    %cst_6 = arith.constant 0.000000e+00 : f32
    %8 = vector.broadcast %cst_6 : f32 to vector<32x8xf32>
    %9 = arith.maximumf %7, %8 : vector<32x8xf32>
    %c0_7 = arith.constant 0 : index
    %c0_8 = arith.constant 0 : index
    %c0_9 = arith.constant 0 : index
    %10 = vector.load %arg8[%c0_7, %c0_8, %c0_9] : memref<1x32x8xf32, #tpu.memory_space<vmem>>, vector<1x32x8xf32>
    %11 = vector.shape_cast %10 : vector<1x32x8xf32> to vector<32x8xf32>
    %12 = vector.shape_cast %9 : vector<32x8xf32> to vector<1x32x8xf32>
    tpu.vector_store %arg8[%c0_7, %c0_8, %c0_9], %12 {strides = array<i32>} : memref<1x32x8xf32, #tpu.memory_space<vmem>>, vector<1x32x8xf32>,
    %13 = vector.extract_strided_slice %6 {offsets = [32, 0], sizes = [32, 8], strides = [1, 1]} : vector<64x8xf32> to vector<32x8xf32>
    %c0_10 = arith.constant 0 : index
    %c0_11 = arith.constant 0 : index
    %14 = vector.load %arg5[%c0_10, %c0_11] : memref<32x32xf32, #tpu.memory_space<vmem>>, vector<32x32xf32>
    %cst_12 = arith.constant dense<0.000000e+00> : vector<32x8xf32>
    %15 = tpu.matmul %14, %9, %cst_12 {dimension_numbers = #tpu.dot_dimension_numbers<[1], [0], [0], [1], [0, 0, 1, 1], [], []>} : vector<32x32xf32>, vector<32x8xf32>, vector<32x8xf32> -> vector<32x8xf32>
    %16 = arith.addf %13, %15 : vector<32x8xf32>
    %17 = math.tanh %16 : vector<32x8xf32>
    %c0_13 = arith.constant 0 : index
    %c0_14 = arith.constant 0 : index
    %18 = vector.load %arg6[%c0_13, %c0_14] : memref<32x32xf32, #tpu.memory_space<vmem>>, vector<32x32xf32>
    %cst_15 = arith.constant dense<0.000000e+00> : vector<32x8xf32>
    %19 = tpu.matmul %18, %17, %cst_15 {dimension_numbers = #tpu.dot_dimension_numbers<[1], [0], [0], [1], [0, 0, 1, 1], [], []>} : vector<32x32xf32>, vector<32x8xf32>, vector<32x8xf32> -> vector<32x8xf32>
    %c0_16 = arith.constant 0 : index
    %c0_17 = arith.constant 0 : index
    %20 = vector.load %arg7[%c0_16, %c0_17] : memref<32x1xf32, #tpu.memory_space<vmem>>, vector<32x1xf32>
    %21 = vector.broadcast %20 : vector<32x1xf32> to vector<32x8xf32>
    %22 = arith.addf %19, %21 : vector<32x8xf32>
    %23 = vector.extract_strided_slice %22 {offsets = [0, 0], sizes = [8, 8], strides = [1, 1]} : vector<32x8xf32> to vector<8x8xf32>
    %24 = vector.extract_strided_slice %22 {offsets = [8, 0], sizes = [8, 8], strides = [1, 1]} : vector<32x8xf32> to vector<8x8xf32>
    %c0_18 = arith.constant 0 : index
    %c0_19 = arith.constant 0 : index
    %c0_20 = arith.constant 0 : index
    %25 = vector.load %arg10[%c0_18, %c0_19, %c0_20] : memref<1x8x8xf32, #tpu.memory_space<vmem>>, vector<1x8x8xf32>
    %26 = vector.shape_cast %25 : vector<1x8x8xf32> to vector<8x8xf32>
    %27 = vector.shape_cast %23 : vector<8x8xf32> to vector<1x8x8xf32>
    tpu.vector_store %arg10[%c0_18, %c0_19, %c0_20], %27 {strides = array<i32>} : memref<1x8x8xf32, #tpu.memory_space<vmem>>, vector<1x8x8xf32>,
    %c0_21 = arith.constant 0 : index
    %c0_22 = arith.constant 0 : index
    %c0_23 = arith.constant 0 : index
    %28 = vector.load %arg11[%c0_21, %c0_22, %c0_23] : memref<1x8x8xf32, #tpu.memory_space<vmem>>, vector<1x8x8xf32>
    %29 = vector.shape_cast %28 : vector<1x8x8xf32> to vector<8x8xf32>
    %30 = vector.shape_cast %24 : vector<8x8xf32> to vector<1x8x8xf32>
    tpu.vector_store %arg11[%c0_21, %c0_22, %c0_23], %30 {strides = array<i32>} : memref<1x8x8xf32, #tpu.memory_space<vmem>>, vector<1x8x8xf32>,
    %31 = vector.extract_strided_slice %22 {offsets = [16, 0], sizes = [16, 8], strides = [1, 1]} : vector<32x8xf32> to vector<16x8xf32>
    %c0_24 = arith.constant 0 : index
    %c0_25 = arith.constant 0 : index
    %c0_26 = arith.constant 0 : index
    %32 = vector.load %arg9[%c0_24, %c0_25, %c0_26] : memref<1x16x8xf32, #tpu.memory_space<vmem>>, vector<1x16x8xf32>
    %33 = vector.shape_cast %32 : vector<1x16x8xf32> to vector<16x8xf32>
    %34 = vector.shape_cast %31 : vector<16x8xf32> to vector<1x16x8xf32>
    tpu.vector_store %arg9[%c0_24, %c0_25, %c0_26], %34 {strides = array<i32>} : memref<1x16x8xf32, #tpu.memory_space<vmem>>, vector<1x16x8xf32>,
    %cst_27 = arith.constant 1.000000e+00 : f32
    %35 = vector.broadcast %cst_27 : f32 to vector<8x8xf32>
    %36 = arith.addf %35, %24 : vector<8x8xf32>
    %37 = arith.mulf %23, %23 : vector<8x8xf32>
    %38 = arith.subf %36, %37 : vector<8x8xf32>
    %39 = math.exp %24 : vector<8x8xf32>
    %40 = arith.subf %38, %39 : vector<8x8xf32>
    %cst_28 = arith.constant dense<0.000000e+00> : vector<8xf32>
    %41 = vector.multi_reduction <add>, %40, %cst_28 [0] : vector<8x8xf32> to vector<8xf32>
    %42 = vector.shape_cast %41 : vector<8xf32> to vector<1x8xf32>
    %cst_29 = arith.constant -5.000000e-01 : f32
    %43 = vector.broadcast %cst_29 : f32 to vector<1x8xf32>
    %44 = arith.mulf %43, %42 : vector<1x8xf32>
    %c0_30 = arith.constant 0 : index
    %c0_31 = arith.constant 0 : index
    %c0_32 = arith.constant 0 : index
    %45 = vector.load %arg12[%c0_30, %c0_31, %c0_32] : memref<1x1x8xf32, #tpu.memory_space<vmem>>, vector<1x1x8xf32>
    %46 = vector.shape_cast %45 : vector<1x1x8xf32> to vector<1x8xf32>
    %47 = vector.shape_cast %44 : vector<1x8xf32> to vector<1x1x8xf32>
    tpu.vector_store %arg12[%c0_30, %c0_31, %c0_32], %47 {strides = array<i32>} : memref<1x1x8xf32, #tpu.memory_space<vmem>>, vector<1x1x8xf32>,
    return
  }
  func.func @transform_0(%arg0: i32, %arg1: i32) -> (i32, i32, i32) {
    %c0_i32 = arith.constant 0 : i32
    %c0_i32_0 = arith.constant 0 : i32
    return %arg0, %c0_i32, %arg1 : i32, i32, i32
  }
  func.func @transform_1(%arg0: i32, %arg1: i32) -> (i32, i32) {
    %c0_i32 = arith.constant 0 : i32
    %c0_i32_0 = arith.constant 0 : i32
    %c0_i32_1 = arith.constant 0 : i32
    return %c0_i32, %c0_i32_0 : i32, i32
  }
  func.func @transform_2(%arg0: i32, %arg1: i32) -> (i32, i32) {
    %c0_i32 = arith.constant 0 : i32
    %c0_i32_0 = arith.constant 0 : i32
    %c0_i32_1 = arith.constant 0 : i32
    return %c0_i32, %c0_i32_0 : i32, i32
  }
  func.func @transform_3(%arg0: i32, %arg1: i32) -> (i32, i32) {
    %c0_i32 = arith.constant 0 : i32
    %c0_i32_0 = arith.constant 0 : i32
    %c0_i32_1 = arith.constant 0 : i32
    return %c0_i32, %c0_i32_0 : i32, i32
  }
  func.func @transform_4(%arg0: i32, %arg1: i32) -> (i32, i32) {
    %c0_i32 = arith.constant 0 : i32
    %c0_i32_0 = arith.constant 0 : i32
    %c0_i32_1 = arith.constant 0 : i32
    return %c0_i32, %c0_i32_0 : i32, i32
  }
  func.func @transform_5(%arg0: i32, %arg1: i32) -> (i32, i32) {
    %c0_i32 = arith.constant 0 : i32
    %c0_i32_0 = arith.constant 0 : i32
    %c0_i32_1 = arith.constant 0 : i32
    return %c0_i32, %c0_i32_0 : i32, i32
  }
  func.func @transform_6(%arg0: i32, %arg1: i32) -> (i32, i32, i32) {
    %c0_i32 = arith.constant 0 : i32
    %c0_i32_0 = arith.constant 0 : i32
    return %arg0, %c0_i32, %arg1 : i32, i32, i32
  }
  func.func @transform_7(%arg0: i32, %arg1: i32) -> (i32, i32, i32) {
    %c0_i32 = arith.constant 0 : i32
    %c0_i32_0 = arith.constant 0 : i32
    return %arg0, %c0_i32, %arg1 : i32, i32, i32
  }
  func.func @transform_8(%arg0: i32, %arg1: i32) -> (i32, i32, i32) {
    %c0_i32 = arith.constant 0 : i32
    %c0_i32_0 = arith.constant 0 : i32
    return %arg0, %c0_i32, %arg1 : i32, i32, i32
  }
  func.func @transform_9(%arg0: i32, %arg1: i32) -> (i32, i32, i32) {
    %c0_i32 = arith.constant 0 : i32
    %c0_i32_0 = arith.constant 0 : i32
    return %arg0, %c0_i32, %arg1 : i32, i32, i32
  }
  func.func @transform_10(%arg0: i32, %arg1: i32) -> (i32, i32, i32) {
    %c0_i32 = arith.constant 0 : i32
    %c0_i32_0 = arith.constant 0 : i32
    return %arg0, %c0_i32, %arg1 : i32, i32, i32
  }
}

</mosaic_0001>

<bundles_post_ra>
// kernel: model_forward.1
= control target key start
LH: loop header
LB: loop body
LE: loop exit
PB: predicated region body
PF: predicated region fallthrough
CT: control target
= control target key end

     0   :  { %s1911_s0 = inlined_call_operand.vmem [shape: f32[2,16,8], index: 0, kind: input, shape index: {}]   ;;  %s1912_s1 = inlined_call_operand.vmem [shape: f32[64,16], index: 1, kind: input, shape index: {}]   ;;  %s1913_s2 = inlined_call_operand.vmem [shape: f32[64,1], index: 2, kind: input, shape index: {}]   ;;  %s1914_s3 = inlined_call_operand.vmem [shape: f32[32,32], index: 3, kind: input, shape index: {}]   ;;  %s1915_s4 = inlined_call_operand.vmem [shape: f32[32,32], index: 4, kind: input, shape index: {}]   ;;  %s1916_s5 = inlined_call_operand.vmem [shape: f32[32,1], index: 5, kind: input, shape index: {}]   ;;  %s1917_s6 = inlined_call_operand.vmem [shape: f32[2,32,8], index: 6, kind: output, shape index: {0}]   ;;  %s1918_s7 = inlined_call_operand.vmem [shape: f32[2,16,8], index: 7, kind: output, shape index: {1}]   ;;  %s1919_s8 = inlined_call_operand.hbm [shape: f32[2,8,8], index: 8, kind: output, shape index: {2}]   ;;  %s1920_s9 = inlined_call_operand.hbm [shape: f32[2,8,8], index: 9, kind: output, shape index: {3}]   ;;  %s1921_s10 = inlined_call_operand.hbm [shape: f32[2,1,8], index: 10, kind: output, shape index: {4}]  }
   0x1   :  { %1927 = sst [smem:[#allocation11_spill]] %s1911_s0 }
   0x2   :  { %1928 = sst [smem:[#allocation12_spill]] %s1912_s1 }
   0x3   :  { %1929 = sst [smem:[#allocation13_spill]] %s1913_s2 }
   0x4   :  { %1930 = sst [smem:[#allocation14_spill]] %s1914_s3 }
   0x5   :  { %1931 = sst [smem:[#allocation15_spill]] %s1915_s4 }
   0x6   :  { %16 = vsyncpa [#allocation3], 0 }
   0x7   :  { %18 = vsyncpa [#allocation3 + $0x1], 0 }
   0x8   :  { %19 = vsyncpa [#allocation5], 0 }
   0x9   :  { %21 = vsyncpa [#allocation5 + $0x1], 0  ;;  %s1591_s13 = smov 0   ;;  %s1593_s14 = smov 0  }
   0xa   :  { %s1595_s15 = smov 0   ;;  %s1597_s16 = smov 0  }
   0xb   :  { %s1599_s17 = smov 0   ;;  %s1601_s18 = smov 0  }
   0xc LB: > { %1932 = sst [smem:[#allocation9_spill]] %s1526_s17  ;;  %s1923_s19 = sadd.s32 4294967295, %s1530_s18   ;;  %s1530_s18 = sphi %s1601_s18, %s27_s18   ;;  %s1526_s17 = sphi %s1599_s17, %s1945_s17   ;;  %s1522_s16 = sphi %s1597_s16, %s1944_s16   ;;  %s1518_s15 = sphi %s1595_s15, %s1948_s15   ;;  %s1514_s14 = sphi %s1593_s14, %s1947_s14   ;;  %s1510_s13 = sphi %s1591_s13, %s1946_s13  }
   0xd   : > { %s1922_s20 = sadd.s32 4294967294, %s1530_s18   ;;  %s39_s21 = sadd.s32 1, %s1526_s17 }
   0xe   : > { %s237_s22 = sadd.s32 1, %s1518_s15  ;;  %p41_p0 = scmp.ge.s32.totalorder %s39_s21, 2 }
   0xf   : > { %p247_p1 = scmp.ne.s32.totalorder %s1518_s15, %s1514_s14  ;;  %p248_p2 = scmp.eq.s32.totalorder %s1923_s19, 1 }
  0x10   : > { %p253_p3 = scmp.ne.s32.totalorder %s1514_s14, %s1510_s13  ;;  %s1950_s21 = smov (%p41_p0, %s39_s21), 0 }
  0x11   : > { %1933 = sst [smem:[#allocation10_spill]] %s1950_s21  ;;  %p1633_p4 = por %p248_p2, %p247_p1 }
  0x12   : > { %p254_p5 = scmp.eq.s32.totalorder %s1922_s20, 1  ;;  %s232_s24 = ssub.s32 %s1526_s17, %s1950_s21 }
  0x13   : > { %p1179_p6 = scmp.ge.s32.totalorder %s1530_s18, 1  ;;  %p235_p7 = scmp.eq.s32.totalorder %s232_s24, 0 }
  0x14   : > { %p1642_p8 = por %p254_p5, %p253_p3  ;;  %p354_p9 = scmp.lt.s32.totalorder %s1530_s18, 3 }
  0x15   : > { %s1648_s26 = scalar_select %p235_p7, %s1518_s15, %s237_s22  }
  0x16   : > { %p355_p10 = pnand %p1179_p6, %p354_p9 }
  0x17   : > { %p420_p11 = scmp.lt.s32.totalorder (!%p355_p10), %s1522_s16, 1  ;;  %s1936_s1 = sld [smem:[#allocation12_spill]] (!%p355_p10)  ;;  %vm502_vm0 = vcmask (!%p355_p10), 130048   ;;  %v1532_v2 = vmov (!%p355_p10), 0   ;;  %v756_v20 = vld [vmem:[%s1916_s5 + $0x8] sm:$0xff] (!%p355_p10)  ;;  %v755_v21 = vld [vmem:[%s1916_s5] sm:$0xff] (!%p355_p10) }
  0x18   : > { %358 = sbr.rel (%p355_p10) target bundleno = 789 (0x315), region = 44  ;;  %1380 = vset.pattern.permute.xlu0 (!%p355_p10), %v1532_v2  ;;  %s1937_s2 = sld [smem:[#allocation13_spill]] (!%p355_p10)  ;;  %1381 = vset.pattern.permute.xlu1 (!%p355_p10), %v1532_v2  ;;  %v757_v22 = vld [vmem:[%s1916_s5 + $0x10] sm:$0xff] (!%p355_p10)  ;;  %v758_v23 = vld [vmem:[%s1916_s5 + $0x18] sm:$0xff] (!%p355_p10)  ;;  %vm645_vm1 = vcmask (!%p355_p10), 261120   ;;  %vm636_vm2 = vcmask (!%p355_p10), 64512  }
  0x19   : > { %s1938_s0 = sld [smem:[#allocation11_spill]] (!%p355_p10)  ;;  %s1939_s3 = sld [smem:[#allocation14_spill]] (!%p355_p10) }
  0x1a   : > { %s1940_s4 = sld [smem:[#allocation15_spill]] (!%p355_p10)  ;;  %s1769_s30 = sand.u32 (!%p355_p10), 1, %s1514_s14  }
  0x1b   : > { %s1180_s12 = sshll.u32 (!%p355_p10), %s1769_s30, 3  ;;  %s1206_s27 = sshll.u32 (!%p355_p10), %s1522_s16, 7 }
  0x1c   : > { %s1777_s17 = scalar_lea.vmem (!%p355_p10), [#allocation2], %s1180_s12 }
  0x1d   : > { %v446_v0 = vld [vmem:[%s1936_s1] sm:$0xff] (!%p355_p10)  ;;  %v447_v12 = vld [vmem:[%s1936_s1 + $0x8] sm:$0xff] (!%p355_p10)  ;;  %v448_v14 = vld [vmem:[%s1936_s1 + $0x10] sm:$0xff] (!%p355_p10)  ;;  %s942_s20 = sshll.u32 (!%p355_p10), %s1777_s17, 4  ;;  %s1792_s20 = int_to_ptr.vmem [resolvable:$true] %s942_s20 }
  0x1e   : > { %v450_v1 = vld [vmem:[%s1936_s1 + $0x20] sm:$0xff] (!%p355_p10)  ;;  %1244 = vmatprep.mubr.msk.f32.mxu0 (!%p355_p10), %vm502_vm0, %v446_v0  ;;  %v456_v4 = vld [vmem:[%s1937_s2 + $0x10] sm:$0xff] (!%p355_p10)  ;;  %v455_v5 = vld [vmem:[%s1937_s2 + $0x8] sm:$0xff] (!%p355_p10) }
  0x1f   : > { %1250 = vmatprep.mubr.msk.f32.mxu1 %vm502_vm0, %v450_v1  ;;  %s1660_s11 = scalar_select %p420_p11, %s1522_s16, 1  ;;  %v454_v3 = vld [vmem:[%s1937_s2] sm:$0xff]  ;;  %474 = vperm.xlu1 %1381, %v456_v4   ;;  %v457_v6 = vld [vmem:[%s1937_s2 + $0x18] sm:$0xff]  ;;  %v459_v11 = vld [vmem:[%s1937_s2 + $0x28] sm:$0xff] }
  0x20   : > { %464 = vperm.xlu0 %1380, %v454_v3   ;;  %v458_v10 = vld [vmem:[%s1937_s2 + $0x20] sm:$0xff]  ;;  %v451_v13 = vld [vmem:[%s1936_s1 + $0x28] sm:$0xff]  ;;  %v452_v15 = vld [vmem:[%s1936_s1 + $0x30] sm:$0xff] }
  0x21   : > { %s1926_s28 = sshll.u32 %s1660_s11, 4  ;;  %v460_v16 = vld [vmem:[%s1937_s2 + $0x30] sm:$0xff]  ;;  %v461_v17 = vld [vmem:[%s1937_s2 + $0x38] sm:$0xff]  ;;  %v641_v24 = vld [vmem:[%s1939_s3] sm:$0xff]  ;;  %s1212_s22 = sshll.u32 %s1660_s11, 5 }
  0x22   : > { %s427_s21 = scalar_lea.vmem %s1938_s0, %s1926_s28  ;;  %v449_v18 = vld [vmem:[%s1936_s1 + $0x18] sm:$0xff]  ;;  %s435_s29 = scalar_lea.vmem %s1917_s6, %s1212_s22  ;;  %v642_v47 = vld [vmem:[%s1939_s3 + $0x8] sm:$0xff]  ;;  %v643_v48 = vld [vmem:[%s1939_s3 + $0x10] sm:$0xff] }
  0x23   : > { %v444_v7 = vld [vmem:[%s427_s21] sm:$0xff]  ;;  %v445_v8 = vld [vmem:[%s427_s21 + $0x8] sm:$0xff]  ;;  %479 = vperm.xlu1 %1381, %v457_v6   ;;  %v453_v19 = vld [vmem:[%s1936_s1 + $0x38] sm:$0xff]  ;;  %s1941_s22 = sadd.s32 4294967295, %s1530_s18   ;;  %s1783_s0 = scalar_lea.hbm %s1920_s9, %s1206_s27 }
  0x24   : > { %v1284_v9 = vpack.c.bf16 %v445_v8, %v444_v7  ;;  %469 = vperm.xlu0 %1380, %v455_v5   ;;  %v644_v49 = vld [vmem:[%s1939_s3 + $0x18] sm:$0xff]  ;;  %v751_v50 = vld [vmem:[%s1940_s4] sm:$0xff]  ;;  %s1774_s24 = sand.u32 1, %s1941_s22   ;;  %s1790_s1 = scalar_lea.hbm %s1919_s8, %s1206_s27 }
  0x25   : > { %s1942_s28 = sshll.u32 %s1660_s11, 4  ;;  %s918_s27 = scalar_lea.sflag [#allocation5], %s1774_s24 }
  0x26   : > { %1285 = vmatprep.subr.bf16.mxu0 %v1284_v9  ;;  %1304 = vmatprep.subr.bf16.mxu1 %v1284_v9  ;;  %s1801_s3 = scalar_lea.vmem %s1918_s7, %s1942_s28 }
  0x27   : > { %1287 = vmatpush3.bf16.msra.mxu0 %v1284_v9  ;;  %1305 = vmatpush3.bf16.msra.mxu1 %v1284_v9  ;;  %v752_v9 = vld [vmem:[%s1940_s4 + $0x8] sm:$0xff] }
  0x28   : > { %484 = vperm.xlu0 %1380, %v458_v10   ;;  %489 = vperm.xlu1 %1381, %v459_v11   ;;  %v753_v10 = vld [vmem:[%s1940_s4 + $0x10] sm:$0xff]  ;;  %v754_v11 = vld [vmem:[%s1940_s4 + $0x18] sm:$0xff] }
  0x2a   : > { %1245 = vmatmul.mubr.msk.f32.vlgmr.msra.gmra.mrb[0].mxu0 %vm502_vm0, %v447_v12  ;;  %1251 = vmatmul.mubr.msk.f32.vlgmr.msra.gmra.mrb[0].mxu1 %vm502_vm0, %v451_v13 }
  0x2b   : > { %1247 = vmatprep.mubr.msk.f32.mxu0 %vm502_vm0, %v448_v14  ;;  %1253 = vmatprep.mubr.msk.f32.mxu1 %vm502_vm0, %v452_v15 }
  0x2c   : > { %494 = vperm.xlu0 %1380, %v460_v16   ;;  %499 = vperm.xlu1 %1381, %v461_v17  }
  0x2e   : > { %1248 = vmatmul.mubr.msk.f32.gmra.mrb[2].mxu0 %vm502_vm0, %v449_v18  ;;  %1254 = vmatmul.mubr.msk.f32.gmra.mrb[2].mxu1 %vm502_vm0, %v453_v19 }
  0x2f   : > { %1264 = vmatprep.mubr.msk.f32.mxu0 %vm645_vm1, %v641_v24  ;;  %1278 = vmatprep.mubr.msk.f32.mxu1 %vm645_vm1, %v751_v50 }
  0x30   : > { %766 = vperm.xlu0 %1380, %v756_v20   ;;  %761 = vperm.xlu1 %1381, %v755_v21  }
  0x34   : > { %771 = vperm.xlu0 %1380, %v757_v22   ;;  %776 = vperm.xlu1 %1381, %v758_v23  }
  0x9e   : > { %v475_v26 = vpop.permute.xlu1 %474 }
  0x9f   : > { %v465_v25 = vpop.permute.xlu0 %464 }
  0xa2   : > { %v480_v34 = vpop.permute.xlu1 %479 }
  0xa3   : > { %v470_v27 = vpop.permute.xlu0 %469 }
  0xa7   : > { %v490_v51 = vpop.permute.xlu1 %489  ;;  %v485_v52 = vpop.permute.xlu0 %484 }
  0xab   : > { %v500_v58 = vpop.permute.xlu1 %499  ;;  %v495_v60 = vpop.permute.xlu0 %494 }
  0xaf   : > { %v762_v12 = vpop.permute.xlu1 %761  ;;  %v767_v13 = vpop.permute.xlu0 %766 }
  0xb3   : > { %v777_v20 = vpop.permute.xlu1 %776 }
  0xfd   : > { %v1246_v28 = vpop.f32.mrb[0].mxu0  ;;  %v1252_v29 = vpop.f32.mrb[0].mxu1 }
  0xfe   : > { %v599_v30 = vadd.f32 %v1246_v28, %v470_v27  ;;  %v593_v31 = vpop.f32.mrb[1].mxu0  ;;  %v613_v32 = vpop.f32.mrb[1].mxu1  ;;  %v619_v53 = vadd.f32 %v1252_v29, %v490_v51 }
  0xff   : > { %v594_v33 = vadd.f32 %v593_v31, %v465_v25  ;;  %v614_v54 = vadd.f32 %v613_v32, %v485_v52 }
 0x100   : > { %v633_v35 = vmax.f32 %v599_v30, 0.0 }
 0x101   : > { %v632_v36 = vmax.f32 %v594_v33, 0.0  ;;  %v1249_v37 = vpop.f32.mrb[2].mxu0  ;;  %v1255_v38 = vpop.f32.mrb[2].mxu1 }
 0x102   : > { %638 = vst.msk [vmem:[%s435_s29 + $0x8] sm:$0xff] %vm636_vm2, %v633_v35  ;;  %v609_v39 = vadd.f32 %v1249_v37, %v480_v34  ;;  %v603_v40 = vpop.f32.mrb[3].mxu0  ;;  %v623_v41 = vpop.f32.mrb[3].mxu1  ;;  %v629_v61 = vadd.f32 %v1255_v38, %v500_v58 }
 0x103   : > { %637 = vst.msk [vmem:[%s435_s29] sm:$0xff] %vm636_vm2, %v632_v36  ;;  %v1288_v42 = vpack.c.bf16 %v633_v35, %v632_v36  ;;  %v604_v43 = vadd.f32 %v603_v40, %v475_v26  ;;  %v624_v62 = vadd.f32 %v623_v41, %v495_v60 }
 0x104   : > { %v635_v44 = vmax.f32 %v609_v39, 0.0 }
 0x105   : > { %v634_v45 = vmax.f32 %v604_v43, 0.0  ;;  %1289 = vmatprep.subr.bf16.mxu0 %v1288_v42 }
 0x106   : > { %640 = vst.msk [vmem:[%s435_s29 + $0x18] sm:$0xff] %vm636_vm2, %v635_v44  ;;  %1291 = vmatpush3.bf16.msra.mxu0 %v1288_v42 }
 0x107   : > { %639 = vst.msk [vmem:[%s435_s29 + $0x10] sm:$0xff] %vm636_vm2, %v634_v45  ;;  %v1292_v46 = vpack.c.bf16 %v635_v44, %v634_v45  ;;  %s413_s29 = scalar_lea.vmem [#allocation4], %s1180_s12  ;;  %s1533_s12 = smov [#allocation4]  }
 0x108   : > { %s956_s19 = sshll.u32 %s413_s29, 4  ;;  %s1396_s4 = sshll.u32 %s1533_s12, 4  ;;  %s1785_s19 = int_to_ptr.vmem [resolvable:$true] %s956_s19  ;;  %s1397_s4 = int_to_ptr.vmem [resolvable:$false] %s1396_s4 }
 0x109   : > { %1293 = vmatprep.subr.bf16.mxu0 %v1292_v46  ;;  %s1392_s22 = scalar_lea.vmem %s1785_s19, 128  ;;  %s1398_s11 = scalar_lea.vmem %s1397_s4, 256 }
 0x10a   : > { %1295 = vmatpush3.bf16.msra.mxu0 %v1292_v46  ;;  %p1393_p12 = scmp.ne.s32.totalorder %s1785_s19, %s1392_s22  ;;  %p1399_p1 = scmp.lt.s32.totalorder %s1785_s19, %s1397_s4 }
 0x10b   : > { %p1400_p2 = scmp.lt.s32.totalorder %s1398_s11, %s1392_s22 }
 0x10c   : > { %p1394_p13 = pnand %p1393_p12, %p1633_p4 }
 0x10d   : > { %1265 = vmatmul.mubr.msk.f32.vlgmr.msra.gmra.mrb[4].mxu0 %vm645_vm1, %v642_v47  ;;  %p1401_p3 = por %p1400_p2, %p1399_p1 }
 0x10e   : > { %1267 = vmatprep.mubr.msk.f32.mxu0 %vm645_vm1, %v643_v48  ;;  %p1395_p0 = pneg %p1394_p13 }
 0x110   : > { %p1402_p5 = pnand %p1401_p3, %p1395_p0 }
 0x111   : > { %1268 = vmatmul.mubr.msk.f32.gmra.mrb[6].mxu0 %vm645_vm1, %v644_v49 }
 0x1e0   : > { %v1266_v55 = vpop.f32.mrb[4].mxu0 }
 0x1e1   : > { %v744_v56 = vadd.f32 %v1266_v55, %v619_v53  ;;  %v724_v57 = vpop.f32.mrb[5].mxu0 }
 0x1e2   : > { %v743_v59 = vadd.f32 %v724_v57, %v614_v54 }
 0x1e3   : > { %1382 = vtanh.f32 %v744_v56 }
 0x1e4   : > { %1384 = vtanh.f32 %v743_v59  ;;  %v1269_v63 = vpop.f32.mrb[6].mxu0 }
 0x1e5   : > { %v746_v0 = vadd.f32 %v1269_v63, %v629_v61  ;;  %v734_v1 = vpop.f32.mrb[7].mxu0 }
 0x1e6   : > { %v745_v2 = vadd.f32 %v734_v1, %v624_v62 }
 0x1e7   : > { %1386 = vtanh.f32 %v746_v0 }
 0x1e8   : > { %1388 = vtanh.f32 %v745_v2 }
 0x1ed   : > { %v1383_v3 = vpop.eup %1382 }
 0x1ee   : > { %v1385_v4 = vpop.eup %1384 }
 0x1ef   : > { %v1296_v5 = vpack.c.bf16 %v1383_v3, %v1385_v4 }
 0x1f1   : > { %v1387_v6 = vpop.eup %1386  ;;  %1297 = vmatprep.subr.bf16.mxu1 %v1296_v5 }
 0x1f2   : > { %v1389_v7 = vpop.eup %1388  ;;  %1299 = vmatpush3.bf16.msra.mxu1 %v1296_v5 }
 0x1f3   : > { %v1300_v8 = vpack.c.bf16 %v1387_v6, %v1389_v7 }
 0x1f5   : > { %1301 = vmatprep.subr.bf16.mxu1 %v1300_v8 }
 0x1f6   : > { %1303 = vmatpush3.bf16.msra.mxu1 %v1300_v8 }
 0x1f9   : > { %1279 = vmatmul.mubr.msk.f32.vlgmr.msra.gmra.mrb[4].mxu1 %vm645_vm1, %v752_v9 }
 0x1fa   : > { %1281 = vmatprep.mubr.msk.f32.mxu1 %vm645_vm1, %v753_v10 }
 0x1fd   : > { %1282 = vmatmul.mubr.msk.f32.gmra.mrb[6].mxu1 %vm645_vm1, %v754_v11 }
 0x2cc   : > { %v1280_v14 = vpop.f32.mrb[4].mxu1 }
 0x2cd   : > { %v863_v15 = vadd.f32 %v1280_v14, %v767_v13  ;;  %v857_v16 = vpop.f32.mrb[5].mxu1 }
 0x2ce   : > { %v858_v17 = vadd.f32 %v857_v16, %v762_v12 }
 0x2cf   : > { %v1794_v18 = vadd.f32 1.0, %v863_v15  ;;  %v883_v19 = vmul.f32 1.442695, %v863_v15  ;;  %877 = vst.msk [vmem:[%s413_s29] sm:$0xff] %vm636_vm2, %v863_v15 }
 0x2d0   : > { %v1804_v21 = vmul.f32 %v858_v17, %v858_v17  ;;  %v1283_v22 = vpop.f32.mrb[6].mxu1 }
 0x2d1   : > { %1405 = shalt.err (!%p1402_p5)
}
 0x2d2   : > { %s1406_s2 = scalar_lea.hbm %s1783_s0, 128  ;;  %s1410_s21 = scalar_lea.hbm %s1920_s9, 256 }
 0x2d3   : > { %p1407_p6 = scmp.ne.s32.totalorder %s1783_s0, %s1406_s2  ;;  %p1411_p10 = scmp.lt.u32.totalorder %s1783_s0, %s1920_s9 }
 0x2d4   : > { %p1412_p11 = scmp.lt.u32.totalorder %s1410_s21, %s1406_s2  ;;  %p1414_p13 = scmp.lt.u32.totalorder %s1406_s2, %s1783_s0 }
 0x2d5   : > { %p1408_p7 = pnand %p1407_p6, %p1633_p4 }
 0x2d6   : > { %p1413_p12 = por %p1412_p11, %p1411_p10 }
 0x2d7   : > { %p1409_p9 = pneg %p1408_p7 }
 0x2d8   : > { %p1415_p0 = por %p1414_p13, %p1413_p12 }
 0x2da   : > { %p1416_p1 = pnand %p1415_p0, %p1409_p9 }
 0x2dc   : > { %1419 = shalt.err (!%p1416_p1)
}
 0x2dd   : > { %1315 = dma.vmem_to_hbm [thread:$0]  (%p1633_p4), %s1785_s19, 128, %s1783_s0, %s918_s27   ;;  %876 = vst.msk [vmem:[%s1777_s17] sm:$0xff] %vm636_vm2, %v858_v17  ;;  %v772_v23 = vpop.permute.xlu0 %771  ;;  %1390 = vpow2.f32 %v883_v19  ;;  %v873_v24 = vadd.f32 %v1283_v22, %v777_v20  ;;  %v867_v25 = vpop.f32.mrb[7].mxu1 }
 0x2de   : > { %s913_s22 = scalar_lea.sflag [#allocation3], %s1769_s30  ;;  %s1420_s11 = scalar_lea.vmem %s1792_s20, 128 }
 0x2df   : > { %p1421_p2 = scmp.ne.s32.totalorder %s1792_s20, %s1420_s11  ;;  %s1534_s2 = smov [#allocation2]  }
 0x2e0   : > { %s1424_s29 = sshll.u32 %s1534_s2, 4  ;;  %s1425_s29 = int_to_ptr.vmem [resolvable:$false] %s1424_s29 }
 0x2e1   : > { %p1422_p3 = pnand %p1421_p2, %p1633_p4  ;;  %s1426_s28 = scalar_lea.vmem %s1425_s29, 256 }
 0x2e2   : > { %p1427_p6 = scmp.lt.s32.totalorder %s1792_s20, %s1425_s29  ;;  %p1428_p7 = scmp.lt.s32.totalorder %s1426_s28, %s1420_s11 }
 0x2e3   : > { %p1423_p5 = pneg %p1422_p3 }
 0x2e4   : > { %p1429_p9 = por %p1428_p7, %p1427_p6 }
 0x2e6   : > { %p1430_p10 = pnand %p1429_p9, %p1423_p5 }
 0x2e8   : > { %1433 = shalt.err (!%p1430_p10)
}
 0x2e9   : > { %s1434_s0 = scalar_lea.hbm %s1790_s1, 128  ;;  %s1438_s21 = scalar_lea.hbm %s1919_s8, 256 }
 0x2ea   : > { %p1435_p11 = scmp.ne.s32.totalorder %s1790_s1, %s1434_s0  ;;  %p1439_p0 = scmp.lt.u32.totalorder %s1790_s1, %s1919_s8 }
 0x2eb   : > { %p1440_p1 = scmp.lt.u32.totalorder %s1438_s21, %s1434_s0  ;;  %p1442_p3 = scmp.lt.u32.totalorder %s1434_s0, %s1790_s1 }
 0x2ec   : > { %p1436_p12 = pnand %p1435_p11, %p1633_p4 }
 0x2ed   : > { %p1441_p2 = por %p1440_p1, %p1439_p0 }
 0x2ee   : > { %p1437_p13 = pneg %p1436_p12 }
 0x2ef   : > { %p1443_p5 = por %p1442_p3, %p1441_p2 }
 0x2f1   : > { %p1444_p6 = pnand %p1443_p5, %p1437_p13 }
 0x2f3   : > { %1447 = shalt.err (!%p1444_p6)
}
 0x2f4   : > { %1314 = dma.vmem_to_hbm [thread:$0]  (%p1633_p4), %s1792_s20, 128, %s1790_s1, %s913_s22   ;;  %v882_v26 = vsub.f32 %v1794_v18, %v1804_v21  ;;  %v868_v27 = vadd.f32 %v867_v25, %v772_v23  ;;  %879 = vst.msk [vmem:[%s1801_s3 + $0x8] sm:$0xff] %vm636_vm2, %v873_v24  ;;  %v1391_v28 = vpop.eup %1390  ;;  %vm894_vm3 = vcmask 57344  }
 0x2f5   : > { %s1208_s11 = sshll.u32 %s1522_s16, 4  ;;  %s419_s1 = scalar_lea.vmem [#allocation6], %s1769_s30 }
 0x2f6   : > { %878 = vst.msk [vmem:[%s1801_s3] sm:$0xff] %vm636_vm2, %v868_v27  ;;  %v885_v29 = vsub.f32 %v882_v26, %v1391_v28  ;;  %s970_s20 = sshll.u32 %s419_s1, 4  ;;  %s1866_s3 = scalar_lea.hbm %s1921_s10, %s1208_s11  ;;  %s971_s20 = int_to_ptr.vmem [resolvable:$true] %s970_s20 }
 0x2f7   : > { %s1448_s29 = scalar_lea.vmem %s971_s20, 16  ;;  %s1535_s28 = smov [#allocation6]  }
 0x2f8   : > { %v886_v30 = vsel %vm636_vm2, %v885_v29, 0.0  ;;  %p1449_p7 = scmp.ne.s32.totalorder %s971_s20, %s1448_s29  ;;  %s1452_s0 = sshll.u32 %s1535_s28, 4  ;;  %s1453_s0 = int_to_ptr.vmem [resolvable:$false] %s1452_s0 }
 0x2f9   : > { %v887_v31 = vrot.slane %v886_v30, 4  ;;  %s1454_s16 = scalar_lea.vmem %s1453_s0, 32  ;;  %p1455_p11 = scmp.lt.s32.totalorder %s971_s20, %s1453_s0 }
 0x2fa   : > { %p1450_p9 = pnand %p1449_p7, %p1633_p4  ;;  %p1456_p12 = scmp.lt.s32.totalorder %s1454_s16, %s1448_s29 }
 0x2fb   : > { %v888_v32 = vadd.f32 %v887_v31, %v886_v30 }
 0x2fc   : > { %p1451_p10 = pneg %p1450_p9  ;;  %p1457_p13 = por %p1456_p12, %p1455_p11 }
 0x2fd   : > { %v889_v33 = vrot.slane %v888_v32, 2 }
 0x2fe   : > { %p1458_p0 = pnand %p1457_p13, %p1451_p10 }
 0x2ff   : > { %v890_v34 = vadd.f32 %v889_v33, %v888_v32 }
 0x301   : > { %v891_v35 = vrot.slane %v890_v34, 1 }
 0x303   : > { %v892_v36 = vadd.f32 %v891_v35, %v890_v34 }
 0x305   : > { %v893_v37 = vmul.f32 -0.5, %v892_v36 }
 0x307   : > { %895 = vst.msk [vmem:[%s419_s1] sm:$0x1] %vm894_vm3, %v893_v37 }
 0x308   : > { %1461 = shalt.err (!%p1458_p0)
}
 0x309   : > { %s1462_s30 = scalar_lea.hbm %s1866_s3, 16  ;;  %s1466_s21 = scalar_lea.hbm %s1921_s10, 32 }
 0x30a   : > { %p1463_p1 = scmp.ne.s32.totalorder %s1866_s3, %s1462_s30  ;;  %p1467_p5 = scmp.lt.u32.totalorder %s1866_s3, %s1921_s10 }
 0x30b   : > { %p1468_p6 = scmp.lt.u32.totalorder %s1466_s21, %s1462_s30  ;;  %p1470_p9 = scmp.lt.u32.totalorder %s1462_s30, %s1866_s3 }
 0x30c   : > { %p1464_p2 = pnand %p1463_p1, %p1633_p4 }
 0x30d   : > { %p1469_p7 = por %p1468_p6, %p1467_p5 }
 0x30e   : > { %p1465_p3 = pneg %p1464_p2 }
 0x30f   : > { %p1471_p10 = por %p1470_p9, %p1469_p7 }
 0x311   : > { %p1472_p11 = pnand %p1471_p10, %p1465_p3 }
 0x313   : > { %1475 = shalt.err (!%p1472_p11)
}
 0x314   : > { %1316 = dma.vmem_to_hbm [thread:$0]  (%p1633_p4), %s971_s20, 16, %s1866_s3, %s918_s27  }
 0x315 PF: > { %p1330_p12 = scmp.ge.s32.totalorder %s1530_s18, 2  ;;  %s1004_s11 = sand.u32 1, %s1510_s13  }
 0x316   : > { %s1005_s1 = scalar_lea.sflag [#allocation3], %s1004_s11 }
 0x317   : > { %p1321_p13 = pnand %p1330_p12, %p1642_p8 }
 0x319   : > { %1501 = dma.done.wait (!%p1321_p13), %s1005_s1, 128  }
 0x31a   : > { %1503 = vsyncadd (!%p1321_p13), %s1005_s1, 4294967168  ;;  %s1943_s22 = sadd.s32 4294967294, %s1530_s18  }
 0x31b   : > { %s1013_s2 = sand.u32 1, %s1943_s22  }
 0x31c   : > { %s1014_s29 = scalar_lea.sflag [#allocation5], %s1013_s2 }
 0x31d   : > { %1505 = dma.done.wait (!%p1321_p13), %s1014_s29, 144  }
 0x31e   : > { %1507 = vsyncadd (!%p1321_p13), %s1014_s29, 4294967152  ;;  %s27_s18 = sadd.s32 1, %s1530_s18   ;;  %s1944_s16 = sld [smem:[#allocation9_spill]] }
 0x31f   : > { %p24_p4 = scmp.ge.s32.totalorder %s27_s18, 4   ;;  %s1945_s17 = sld [smem:[#allocation10_spill]] }
 0x320   : > { %s1946_s13 = smov %s1514_s14  ;;  %s1947_s14 = smov %s1518_s15 }
 0x321   : > { %s1948_s15 = smov %s1648_s26  ;;  %26 = sbr.rel (!%p24_p4) target bundleno = 12 (0xc), region = 135 }
 0x328   :  { %1027 = vsyncpa [#allocation3], 1 }
 0x329   :  { %1029 = vsyncpa [#allocation3 + $0x1], 1 }
 0x32a   :  { %1030 = vsyncpa [#allocation5], 1 }
 0x32b   :  { %1032 = vsyncpa [#allocation5 + $0x1], 1 }

</bundles_post_ra>
